<compile_context>
chip_gen: v5e
topology: v5e:2x2
jax: 0.10.0
libtpu: 0.0.40
codegen_flags: <defaults>
</compile_context>

<pallas_src>
import jax
import jax.numpy as jnp
from jax.experimental import pallas as pl
from jax.experimental.pallas import tpu as pltpu

H1, H2 = 400, 300            # logical hidden sizes (PyTorch module)
H1_PAD, H2_PAD = 512, 384    # 4*128, 3*128  (lane-dense padded sizes)
LANE = 128


def _round_up(x, m):
    return (x + m - 1) // m * m


def _policy_kernel(scale_ref, x_ref, w1_ref, w2_ref, w3_ref, b_ref, o_ref):
    # Concatenated biases: [0:512) = b1, [512:896) = b2, [896:) = b3.
    # All slice boundaries are multiples of 128 (lane-aligned, no repacking).
    b1 = b_ref[:, :H1_PAD]
    b2 = b_ref[:, H1_PAD:H1_PAD + H2_PAD]
    b3 = b_ref[:, H1_PAD + H2_PAD:]

    # Layer 1: Linear(state_dim -> 512pad) + ReLU   (bf16 MXU, f32 accum)
    x = x_ref[...].astype(jnp.bfloat16)
    h1 = jnp.dot(x, w1_ref[...], preferred_element_type=jnp.float32)
    h1 = jnp.maximum(h1 + b1, 0.0)

    # Layer 2: Linear(512pad -> 384pad) + ReLU
    h2 = jnp.dot(h1.astype(jnp.bfloat16), w2_ref[...],
                 preferred_element_type=jnp.float32)
    h2 = jnp.maximum(h2 + b2, 0.0)

    # Layer 3: Linear(384pad -> A_pad) + Tanh, then scale (SMEM scalar)
    a = jnp.dot(h2.astype(jnp.bfloat16), w3_ref[...],
                preferred_element_type=jnp.float32)
    a = jnp.tanh(a + b3)

    o_ref[...] = (a * scale_ref[0, 0]).astype(o_ref.dtype)


def _pick_tile(B):
    """Generation-aware batch tile.

    Keeps >=2 grid steps whenever B_pad >= 256 (v7x: both TensorCores busy on
    the "parallel" axis) and grows the tile to 256 for large batches (v6e:
    amortize per-step pipeline overhead).  v5e is happy with either (128-wide
    MXU; footprint well under its 16 MiB scoped-VMEM default).
    """
    if B <= 128:
        return _round_up(B, 8)
    if _round_up(B, 128) <= 256:
        return 128
    return 256


def policy_forward(state, params, action_dim, scale=1.0, *,
                   return_padded=False, out_dtype=jnp.float32):
    """state: (B, state_dim) f32; params: padded dict (see init_params).

    Returns (B, action_dim) `out_dtype`, or the padded (B_pad, A_pad) kernel
    output if return_padded=True (avoids an extra output-slice copy; consumer
    can fuse the slice or ignore the zero-padded tail columns).
    """
    w1, w2, w3 = params["w1"], params["w2"], params["w3"]   # bf16, (in,out)
    b = params["b"]                                          # (1, 1024+A_pad) f32

    B, S = state.shape
    A_pad = w3.shape[1]

    TM = _pick_tile(B)
    B_pad = _round_up(B, TM)
    if B_pad != B:
        state = jnp.pad(state, ((0, B_pad - B), (0, 0)))

    scale_arr = jnp.asarray(scale, jnp.float32).reshape(1, 1)

    # Weights / biases: same block every grid step -> VMEM-resident (fetched
    # once per call, not per grid step).
    wspec = lambda shp: pl.BlockSpec(shp, lambda i: (0, 0))

    out_pad = pl.pallas_call(
        _policy_kernel,
        out_shape=jax.ShapeDtypeStruct((B_pad, A_pad), out_dtype),
        grid=(B_pad // TM,),
        in_specs=[
            pl.BlockSpec(memory_space=pltpu.MemorySpace.SMEM),   # scale (1,1)
            pl.BlockSpec((TM, S), lambda i: (i, 0)),             # state tile
            wspec(w1.shape), wspec(w2.shape), wspec(w3.shape),
            wspec(b.shape),
        ],
        out_specs=pl.BlockSpec((TM, A_pad), lambda i: (i, 0)),
        compiler_params=pltpu.CompilerParams(
            dimension_semantics=("parallel",)),
    )(scale_arr, state, w1, w2, w3, b)

    if return_padded:
        return out_pad
    return out_pad[:B, :action_dim]


def init_params(key, state_dim, action_dim):
    """Deterministic synthetic params, pre-padded, bf16 weights, fused bias.

    PyTorch Linear weight is (out,in); we store the transpose (in,out) so the
    kernel computes x @ W + b.  Hidden dims are zero-padded 400->512, 300->384
    and action_dim -> multiple of 128; padding is zero so results are exact.
    The three biases are concatenated into one (1, 512+384+A_pad) f32 row.
    """
    ks = jax.random.split(key, 6)

    def uniform(k, shape, fan_in):
        bound = 1.0 / jnp.sqrt(fan_in)
        return jax.random.uniform(k, shape, jnp.float32, -bound, bound)

    a_pad = _round_up(action_dim, LANE)

    w1 = uniform(ks[0], (state_dim, H1), state_dim)
    b1 = uniform(ks[1], (1, H1), state_dim)
    w2 = uniform(ks[2], (H1, H2), H1)
    b2 = uniform(ks[3], (1, H2), H1)
    w3 = uniform(ks[4], (H2, action_dim), H2)
    b3 = uniform(ks[5], (1, action_dim), H2)

    def pad2(x, rows, cols):
        return jnp.pad(x, ((0, rows - x.shape[0]), (0, cols - x.shape[1])))

    b_all = jnp.concatenate(
        [pad2(b1, 1, H1_PAD), pad2(b2, 1, H2_PAD), pad2(b3, 1, a_pad)], axis=1)

    return {
        "w1": pad2(w1, state_dim, H1_PAD).astype(jnp.bfloat16),
        "w2": pad2(w2, H1_PAD, H2_PAD).astype(jnp.bfloat16),
        "w3": pad2(w3, H2_PAD, a_pad).astype(jnp.bfloat16),
        "b": b_all,   # (1, H1_PAD + H2_PAD + a_pad) f32
    }


def policy_reference(state, params, scale=1.0):
    """Pure-JAX reference using the same padded bf16 params / f32 accum."""
    b = params["b"]
    b1 = b[:, :H1_PAD]
    b2 = b[:, H1_PAD:H1_PAD + H2_PAD]
    b3 = b[:, H1_PAD + H2_PAD:]

    x = state.astype(jnp.bfloat16)
    h1 = jnp.maximum(
        jnp.dot(x, params["w1"], preferred_element_type=jnp.float32) + b1, 0.0)
    h2 = jnp.maximum(
        jnp.dot(h1.astype(jnp.bfloat16), params["w2"],
                preferred_element_type=jnp.float32) + b2, 0.0)
    a = jnp.tanh(
        jnp.dot(h2.astype(jnp.bfloat16), params["w3"],
                preferred_element_type=jnp.float32) + b3)
    return a * scale


if __name__ == "__main__":
    key = jax.random.PRNGKey(0)
    k_param, k_state = jax.random.split(key)

    batch, state_dim, action_dim, scale = 2, 16, 8, 2.0

    params = init_params(k_param, state_dim, action_dim)
    state = jax.random.normal(k_state, (batch, state_dim), jnp.float32)

    out = policy_forward(state, params, action_dim, scale=scale)
    out = jax.block_until_ready(out)

    ref = policy_reference(state, params, scale=scale)[:batch, :action_dim]

    assert out.shape == (batch, action_dim)
    assert jnp.allclose(out, ref, atol=1e-3, rtol=1e-3), "mismatch vs reference"

    # Exercise a multi-step grid (>=2 steps -> v7x megacore path) as well.
    big_state = jax.random.normal(k_state, (300, state_dim), jnp.float32)
    big_out = jax.block_until_ready(
        policy_forward(big_state, params, action_dim, scale=scale,
                       return_padded=True))
    big_ref = policy_reference(big_state, params, scale=scale)
    assert jnp.allclose(big_out[:300, :action_dim],
                        big_ref[:, :action_dim], atol=1e-3, rtol=1e-3)

    print("KERNEL_OK")
</pallas_src>

<mosaic_0001>
module attributes {stable_mosaic.version = 11 : i64} {
  func.func @_policy_kernel(%arg0: i32, %arg1: memref<1x1xf32, #tpu.memory_space<smem>>, %arg2: memref<8x16xf32, #tpu.memory_space<vmem>>, %arg3: memref<16x512xbf16, #tpu.memory_space<vmem>>, %arg4: memref<512x384xbf16, #tpu.memory_space<vmem>>, %arg5: memref<384x128xbf16, #tpu.memory_space<vmem>>, %arg6: memref<1x1024xf32, #tpu.memory_space<vmem>>, %arg7: memref<8x128xf32, #tpu.memory_space<vmem>>) attributes {dimension_semantics = [#tpu.dimension_semantics<parallel>], iteration_bounds = array<i64: 1>, scalar_prefetch = 0 : i64, scratch_operands = 0 : i64, tpu.core_type = #tpu.core_type<tc>, window_params = [{transform_indices = @transform_0, window_bounds = array<i64: 1, 1>}, {transform_indices = @transform_1, window_bounds = array<i64: 8, 16>}, {pipeline_mode = #tpu.pipeline_mode<synchronous>, transform_indices = @transform_2, window_bounds = array<i64: 16, 512>}, {pipeline_mode = #tpu.pipeline_mode<synchronous>, transform_indices = @transform_3, window_bounds = array<i64: 512, 384>}, {pipeline_mode = #tpu.pipeline_mode<synchronous>, transform_indices = @transform_4, window_bounds = array<i64: 384, 128>}, {pipeline_mode = #tpu.pipeline_mode<synchronous>, transform_indices = @transform_5, window_bounds = array<i64: 1, 1024>}, {transform_indices = @transform_6, window_bounds = array<i64: 8, 128>}]} {
    %c0 = arith.constant 0 : index
    %c0_0 = arith.constant 0 : index
    %0 = vector.load %arg6[%c0, %c0_0] : memref<1x1024xf32, #tpu.memory_space<vmem>>, vector<1x512xf32>
    %c0_1 = arith.constant 0 : index
    %c512 = arith.constant 512 : index
    %1 = vector.load %arg6[%c0_1, %c512] : memref<1x1024xf32, #tpu.memory_space<vmem>>, vector<1x384xf32>
    %c0_2 = arith.constant 0 : index
    %c896 = arith.constant 896 : index
    %2 = vector.load %arg6[%c0_2, %c896] : memref<1x1024xf32, #tpu.memory_space<vmem>>, vector<1x128xf32>
    %c0_3 = arith.constant 0 : index
    %c0_4 = arith.constant 0 : index
    %3 = vector.load %arg2[%c0_3, %c0_4] : memref<8x16xf32, #tpu.memory_space<vmem>>, vector<8x16xf32>
    %4 = arith.truncf %3 : vector<8x16xf32> to vector<8x16xbf16>
    %c0_5 = arith.constant 0 : index
    %c0_6 = arith.constant 0 : index
    %5 = vector.load %arg3[%c0_5, %c0_6] : memref<16x512xbf16, #tpu.memory_space<vmem>>, vector<16x512xbf16>
    %cst = arith.constant dense<0.000000e+00> : vector<8x512xf32>
    %6 = tpu.matmul %4, %5, %cst {dimension_numbers = #tpu.dot_dimension_numbers<[1], [0], [0], [1], [0, 0, 1, 1], [], []>} : vector<8x16xbf16>, vector<16x512xbf16>, vector<8x512xf32> -> vector<8x512xf32>
    %7 = vector.broadcast %0 : vector<1x512xf32> to vector<8x512xf32>
    %8 = arith.addf %6, %7 : vector<8x512xf32>
    %cst_7 = arith.constant 0.000000e+00 : f32
    %9 = vector.broadcast %cst_7 : f32 to vector<8x512xf32>
    %10 = arith.maximumf %8, %9 : vector<8x512xf32>
    %11 = arith.truncf %10 : vector<8x512xf32> to vector<8x512xbf16>
    %c0_8 = arith.constant 0 : index
    %c0_9 = arith.constant 0 : index
    %12 = vector.load %arg4[%c0_8, %c0_9] : memref<512x384xbf16, #tpu.memory_space<vmem>>, vector<512x384xbf16>
    %cst_10 = arith.constant dense<0.000000e+00> : vector<8x384xf32>
    %13 = tpu.matmul %11, %12, %cst_10 {dimension_numbers = #tpu.dot_dimension_numbers<[1], [0], [0], [1], [0, 0, 1, 1], [], []>} : vector<8x512xbf16>, vector<512x384xbf16>, vector<8x384xf32> -> vector<8x384xf32>
    %14 = vector.broadcast %1 : vector<1x384xf32> to vector<8x384xf32>
    %15 = arith.addf %13, %14 : vector<8x384xf32>
    %cst_11 = arith.constant 0.000000e+00 : f32
    %16 = vector.broadcast %cst_11 : f32 to vector<8x384xf32>
    %17 = arith.maximumf %15, %16 : vector<8x384xf32>
    %18 = arith.truncf %17 : vector<8x384xf32> to vector<8x384xbf16>
    %c0_12 = arith.constant 0 : index
    %c0_13 = arith.constant 0 : index
    %19 = vector.load %arg5[%c0_12, %c0_13] : memref<384x128xbf16, #tpu.memory_space<vmem>>, vector<384x128xbf16>
    %cst_14 = arith.constant dense<0.000000e+00> : vector<8x128xf32>
    %20 = tpu.matmul %18, %19, %cst_14 {dimension_numbers = #tpu.dot_dimension_numbers<[1], [0], [0], [1], [0, 0, 1, 1], [], []>} : vector<8x384xbf16>, vector<384x128xbf16>, vector<8x128xf32> -> vector<8x128xf32>
    %21 = vector.broadcast %2 : vector<1x128xf32> to vector<8x128xf32>
    %22 = arith.addf %20, %21 : vector<8x128xf32>
    %23 = math.tanh %22 : vector<8x128xf32>
    %c0_15 = arith.constant 0 : index
    %c0_16 = arith.constant 0 : index
    %24 = memref.load %arg1[%c0_15, %c0_16] : memref<1x1xf32, #tpu.memory_space<smem>>
    %25 = vector.broadcast %24 : f32 to vector<8x128xf32>
    %26 = arith.mulf %23, %25 : vector<8x128xf32>
    %c0_17 = arith.constant 0 : index
    %c0_18 = arith.constant 0 : index
    %27 = vector.load %arg7[%c0_17, %c0_18] : memref<8x128xf32, #tpu.memory_space<vmem>>, vector<8x128xf32>
    tpu.vector_store %arg7[%c0_17, %c0_18], %26 {strides = array<i32>} : memref<8x128xf32, #tpu.memory_space<vmem>>, vector<8x128xf32>,
    return
  }
  func.func @transform_0(%arg0: i32) -> (i32, i32) {
    %c0_i32 = arith.constant 0 : i32
    %c0_i32_0 = arith.constant 0 : i32
    %c0_i32_1 = arith.constant 0 : i32
    return %c0_i32, %c0_i32_0 : i32, i32
  }
  func.func @transform_1(%arg0: i32) -> (i32, i32) {
    %c0_i32 = arith.constant 0 : i32
    %c0_i32_0 = arith.constant 0 : i32
    return %arg0, %c0_i32 : i32, i32
  }
  func.func @transform_2(%arg0: i32) -> (i32, i32) {
    %c0_i32 = arith.constant 0 : i32
    %c0_i32_0 = arith.constant 0 : i32
    %c0_i32_1 = arith.constant 0 : i32
    return %c0_i32, %c0_i32_0 : i32, i32
  }
  func.func @transform_3(%arg0: i32) -> (i32, i32) {
    %c0_i32 = arith.constant 0 : i32
    %c0_i32_0 = arith.constant 0 : i32
    %c0_i32_1 = arith.constant 0 : i32
    return %c0_i32, %c0_i32_0 : i32, i32
  }
  func.func @transform_4(%arg0: i32) -> (i32, i32) {
    %c0_i32 = arith.constant 0 : i32
    %c0_i32_0 = arith.constant 0 : i32
    %c0_i32_1 = arith.constant 0 : i32
    return %c0_i32, %c0_i32_0 : i32, i32
  }
  func.func @transform_5(%arg0: i32) -> (i32, i32) {
    %c0_i32 = arith.constant 0 : i32
    %c0_i32_0 = arith.constant 0 : i32
    %c0_i32_1 = arith.constant 0 : i32
    return %c0_i32, %c0_i32_0 : i32, i32
  }
  func.func @transform_6(%arg0: i32) -> (i32, i32) {
    %c0_i32 = arith.constant 0 : i32
    %c0_i32_0 = arith.constant 0 : i32
    return %arg0, %c0_i32 : i32, i32
  }
}

</mosaic_0001>

<bundles_post_ra>
// kernel: tpu_custom_call.1
= control target key start
LH: loop header
LB: loop body
LE: loop exit
PB: predicated region body
PF: predicated region fallthrough
CT: control target
= control target key end

     0   :  { %12 = vsyncpa [#allocation4], 0  ;;  %s2164_s0 = inlined_call_operand.<no memory space> [shape: f32[1,1], index: 0, kind: input, shape index: {}]   ;;  %s2165_s1 = inlined_call_operand.hbm [shape: f32[8,16], index: 1, kind: input, shape index: {}]   ;;  %s2166_s2 = inlined_call_operand.hbm [shape: bf16[16,512], index: 2, kind: input, shape index: {}]   ;;  %s2167_s3 = inlined_call_operand.hbm [shape: bf16[512,384], index: 3, kind: input, shape index: {}]   ;;  %s2168_s4 = inlined_call_operand.hbm [shape: bf16[384,128], index: 4, kind: input, shape index: {}]   ;;  %s2169_s5 = inlined_call_operand.hbm [shape: f32[1,1024], index: 5, kind: input, shape index: {}]   ;;  %s2170_s6 = inlined_call_operand.hbm [shape: f32[8,128], index: 6, kind: output, shape index: {}]  }
   0x1   :  { %13 = vsyncpa [#allocation7], 0 }
   0x2   :  { %14 = vsyncpa [#allocation10], 0  ;;  %s33_s23 = sshll.u32 %s2166_s2, 4  ;;  %s34_s23 = int_to_ptr.hbm [resolvable:$true] %s33_s23 }
   0x3   :  { %15 = vsyncpa [#allocation5], 0  ;;  %s2060_s24 = smov [#allocation6]   ;;  %s59_s28 = sshll.u32 %s2168_s4, 4  ;;  %s60_s28 = int_to_ptr.hbm [resolvable:$true] %s59_s28 }
   0x4   :  { %s35_s25 = sshll.u32 %s2060_s24, 4  ;;  %s2061_s29 = smov 256   ;;  %s36_s25 = int_to_ptr.vmem [resolvable:$true] %s35_s25 }
   0x5   :  { %s2062_s30 = smov 16   ;;  %s2063_s7 = smov [#allocation9]  }
   0x6   :  { %41 = dma.hbm_to_vmem [thread:$0]  %s34_s23, 512, %s36_s25, [#allocation7], %s2061_s29, %s2061_s29, %s2062_s30  }
   0x7   :  { %s61_s8 = sshll.u32 %s2063_s7, 4  ;;  %s2064_s9 = smov 64   ;;  %s62_s8 = int_to_ptr.vmem [resolvable:$true] %s61_s8 }
   0x8   :  { %s2065_s10 = smov 4   ;;  %s23_s12 = sshll.u32 %s2165_s1, 4  ;;  %s24_s12 = int_to_ptr.hbm [resolvable:$true] %s23_s12 }
   0x9   :  { %67 = dma.hbm_to_vmem [thread:$0]  %s60_s28, 3072, %s62_s8, [#allocation10], %s2064_s9, %s2064_s9, %s2065_s10  }
   0xa   :  { %s2066_s13 = smov [#allocation3]   ;;  %s46_s16 = sshll.u32 %s2167_s3, 4  ;;  %s47_s16 = int_to_ptr.hbm [resolvable:$true] %s46_s16 }
   0xb   :  { %s25_s14 = sshll.u32 %s2066_s13, 4  ;;  %s2067_s17 = smov [#allocation8]   ;;  %s26_s14 = int_to_ptr.vmem [resolvable:$true] %s25_s14 }
   0xc   :  { %28 = dma.hbm_to_vmem [thread:$0]  %s24_s12, 128, %s26_s14, [#allocation4]  }
   0xd   :  { %s48_s18 = sshll.u32 %s2067_s17, 4  ;;  %s2068_s19 = smov 192   ;;  %s49_s18 = int_to_ptr.vmem [resolvable:$true] %s48_s18 }
   0xe   :  { %s2069_s20 = smov 12   ;;  %s73_s1 = sshll.u32 %s2169_s5, 4  ;;  %s74_s1 = int_to_ptr.hbm [resolvable:$true] %s73_s1 }
   0xf   :  { %54 = dma.hbm_to_vmem [thread:$0]  %s47_s16, 12288, %s49_s18, [#allocation7], %s2068_s19, %s2068_s19, %s2069_s20  }
  0x10   :  { %s2070_s23 = smov [#allocation11]  }
  0x11   :  { %s75_s24 = sshll.u32 %s2070_s23, 4  ;;  %s76_s24 = int_to_ptr.vmem [resolvable:$true] %s75_s24 }
  0x12   :  { %78 = dma.hbm_to_vmem [thread:$0]  %s74_s1, 128, %s76_s24, [#allocation10]  }
  0x13   :  { %2052 = dma.done.wait [#allocation4], 128  }
  0x14   :  { %2053 = vsyncadd [#allocation4], 4294967168 }
  0x15   :  { %2054 = dma.done.wait [#allocation7], 12800  }
  0x16   :  { %2055 = vsyncadd [#allocation7], 4294954496 }
  0x17   :  { %2056 = dma.done.wait [#allocation10], 3200  }
  0x18   :  { %2057 = vsyncadd [#allocation10], 4294964096  ;;  %v1271_v0 = vld [vmem:[#allocation6] sm:$0xf]  ;;  %v1771_v1 = vld [vmem:[#allocation6 + $0xc] sm:$0xf0] }
  0x19   :  { %v1769_v2 = vld [vmem:[#allocation6 + $0x4] sm:$0xf]  ;;  %v1272_v3 = vor.u32 %v1771_v1, %v1271_v0  ;;  %v1273_v4 = vld [vmem:[#allocation6 + $0x10] sm:$0xf0]  ;;  %v1279_v5 = vld [vmem:[#allocation6 + $0x8] sm:$0xf] }
  0x1a   :  { %v1772_v6 = vld [vmem:[#allocation6 + $0x14] sm:$0xf0]  ;;  %v1276_v7 = vor.u32 %v1769_v2, %v1273_v4  ;;  %vm138_vm0 = vcmask 130048   ;;  %v1770_v10 = vld [vmem:[#allocation6 + $0xc] sm:$0xf]  ;;  %s2071_s25 = smov [#allocation12]  }
  0x1b   :  { %v1280_v8 = vor.u32 %v1772_v6, %v1279_v5  ;;  %v103_v9 = vld [vmem:[#allocation3] sm:$0xff]  ;;  %149 = vmatpush.bf16.msra.mxu3 %v1272_v3  ;;  %v1471_v14 = vld [vmem:[#allocation8 + $0x168] sm:$0xf]  ;;  %v1819_v15 = vld [vmem:[#allocation8 + $0x170] sm:$0xf0]  ;;  %s1255_s26 = sshll.u32 %s2071_s25, 4  ;;  %s1256_s26 = int_to_ptr.vmem [resolvable:$true] %s1255_s26 }
  0x1c   :  { %v1281_v11 = vld [vmem:[#allocation6 + $0x18] sm:$0xf0]  ;;  %v2122_v12 = vpack.c.bf16 %v103_v9, %v103_v9  ;;  %v1459_v16 = vld [vmem:[#allocation8 + $0x150] sm:$0xf]  ;;  %162 = vmatpush.bf16.msra.mxu1 %v1276_v7  ;;  %v1472_v17 = vor.u32 %v1819_v15, %v1471_v14  ;;  %v1375_v19 = vld [vmem:[#allocation8 + $0xa8] sm:$0xf] }
  0x1d   :  { %v1284_v13 = vor.u32 %v1770_v10, %v1281_v11  ;;  %175 = vmatpush.bf16.msra.mxu2 %v1280_v8  ;;  %v1816_v18 = vld [vmem:[#allocation8 + $0x158] sm:$0xf0]  ;;  %v1795_v20 = vld [vmem:[#allocation8 + $0xb0] sm:$0xf0]  ;;  %v1567_v22 = vld [vmem:[#allocation8 + $0x228] sm:$0xf] }
  0x1e   :  { %v1376_v21 = vor.u32 %v1795_v20, %v1375_v19  ;;  %v1843_v23 = vld [vmem:[#allocation8 + $0x230] sm:$0xf0]  ;;  %1285 = vmatmul.msk.bf16.vlgmr.msra.gmra.mxu3 %vm138_vm0, %v2122_v12  ;;  %v1460_v24 = vor.u32 %v1816_v18, %v1459_v16  ;;  %v1447_v26 = vld [vmem:[#allocation8 + $0x138] sm:$0xf]  ;;  %v1363_v27 = vld [vmem:[#allocation8 + $0x90] sm:$0xf] }
  0x1f   :  { %188 = vmatpush.bf16.msrb.mxu3 %v1284_v13  ;;  %v1568_v25 = vor.u32 %v1843_v23, %v1567_v22  ;;  %v1792_v28 = vld [vmem:[#allocation8 + $0x98] sm:$0xf0]  ;;  %1286 = vmatmul.msk.bf16.vlgmr.msra.gmra.mxu1 %vm138_vm0, %v2122_v12  ;;  %v1813_v29 = vld [vmem:[#allocation8 + $0x140] sm:$0xf0]  ;;  %v1555_v30 = vld [vmem:[#allocation8 + $0x210] sm:$0xf] }
  0x20   :  { %862 = vmatpush.bf16.msrb.mxu1 %v1472_v17  ;;  %1287 = vmatmul.msk.bf16.vlgmr.msra.gmra.mxu2 %vm138_vm0, %v2122_v12  ;;  %v1840_v31 = vld [vmem:[#allocation8 + $0x218] sm:$0xf0]  ;;  %v1364_v32 = vor.u32 %v1792_v28, %v1363_v27  ;;  %v1351_v34 = vld [vmem:[#allocation8 + $0x78] sm:$0xf]  ;;  %v1789_v35 = vld [vmem:[#allocation8 + $0x80] sm:$0xf0]  ;;  %v1448_v38 = vor.u32 %v1813_v29, %v1447_v26 }
  0x21   :  { %849 = vmatpush.bf16.msra.mxu0 %v1376_v21  ;;  %875 = vmatpush.bf16.msrb.mxu2 %v1568_v25  ;;  %v1556_v33 = vor.u32 %v1840_v31, %v1555_v30  ;;  %v1543_v36 = vld [vmem:[#allocation8 + $0x1f8] sm:$0xf]  ;;  %v1837_v37 = vld [vmem:[#allocation8 + $0x200] sm:$0xf0]  ;;  %v1435_v39 = vld [vmem:[#allocation8 + $0x120] sm:$0xf]  ;;  %v1352_v41 = vor.u32 %v1789_v35, %v1351_v34 }
  0x22   :  { %v1810_v40 = vld [vmem:[#allocation8 + $0x128] sm:$0xf0]  ;;  %v1544_v42 = vor.u32 %v1837_v37, %v1543_v36  ;;  %v1339_v43 = vld [vmem:[#allocation8 + $0x60] sm:$0xf]  ;;  %v1663_v47 = vld [vmem:[#allocation8 + $0x2e8] sm:$0xf] }
  0x23   :  { %v1786_v44 = vld [vmem:[#allocation8 + $0x68] sm:$0xf0]  ;;  %v1531_v45 = vld [vmem:[#allocation8 + $0x1e0] sm:$0xf]  ;;  %v1436_v48 = vor.u32 %v1810_v40, %v1435_v39  ;;  %v1867_v49 = vld [vmem:[#allocation8 + $0x2f0] sm:$0xf0] }
  0x24   :  { %863 = vmatpush.bf16.msrb.mxu1 %v1460_v24  ;;  %v1834_v46 = vld [vmem:[#allocation8 + $0x1e8] sm:$0xf0]  ;;  %v1423_v50 = vld [vmem:[#allocation8 + $0x108] sm:$0xf]  ;;  %v1807_v51 = vld [vmem:[#allocation8 + $0x110] sm:$0xf0]  ;;  %v1664_v52 = vor.u32 %v1867_v49, %v1663_v47  ;;  %v1340_v53 = vor.u32 %v1786_v44, %v1339_v43 }
  0x25   :  { %850 = vmatpush.bf16.msra.mxu0 %v1364_v32  ;;  %876 = vmatpush.bf16.msrb.mxu2 %v1556_v33  ;;  %v1532_v54 = vor.u32 %v1834_v46, %v1531_v45  ;;  %v1327_v55 = vld [vmem:[#allocation8 + $0x48] sm:$0xf]  ;;  %v1651_v56 = vld [vmem:[#allocation8 + $0x2d0] sm:$0xf]  ;;  %v1864_v57 = vld [vmem:[#allocation8 + $0x2d8] sm:$0xf0]  ;;  %v1424_v62 = vor.u32 %v1807_v51, %v1423_v50 }
  0x26   :  { %v1783_v58 = vld [vmem:[#allocation8 + $0x50] sm:$0xf0]  ;;  %v1519_v59 = vld [vmem:[#allocation8 + $0x1c8] sm:$0xf]  ;;  %888 = vmatpush.bf16.msra.mxu3 %v1664_v52  ;;  %v1652_v61 = vor.u32 %v1864_v57, %v1651_v56  ;;  %v1411_v63 = vld [vmem:[#allocation8 + $0xf0] sm:$0xf] }
  0x27   :  { %v1831_v60 = vld [vmem:[#allocation8 + $0x1d0] sm:$0xf0]  ;;  %v1804_v0 = vld [vmem:[#allocation8 + $0xf8] sm:$0xf0]  ;;  %v1639_v1 = vld [vmem:[#allocation8 + $0x2b8] sm:$0xf]  ;;  %v1328_v2 = vor.u32 %v1783_v58, %v1327_v55 }
  0x28   :  { %864 = vmatpush.bf16.msrb.mxu1 %v1448_v38  ;;  %v1520_v3 = vor.u32 %v1831_v60, %v1519_v59  ;;  %v1315_v4 = vld [vmem:[#allocation8 + $0x30] sm:$0xf]  ;;  %v1861_v5 = vld [vmem:[#allocation8 + $0x2c0] sm:$0xf0]  ;;  %v1780_v6 = vld [vmem:[#allocation8 + $0x38] sm:$0xf0]  ;;  %v1412_v10 = vor.u32 %v1804_v0, %v1411_v63 }
  0x29   :  { %851 = vmatpush.bf16.msra.mxu0 %v1352_v41  ;;  %877 = vmatpush.bf16.msrb.mxu2 %v1544_v42  ;;  %v1507_v7 = vld [vmem:[#allocation8 + $0x1b0] sm:$0xf]  ;;  %v1828_v8 = vld [vmem:[#allocation8 + $0x1b8] sm:$0xf0]  ;;  %v1640_v9 = vor.u32 %v1861_v5, %v1639_v1  ;;  %v1627_v11 = vld [vmem:[#allocation8 + $0x2a0] sm:$0xf]  ;;  %v1316_v16 = vor.u32 %v1780_v6, %v1315_v4 }
  0x2a   :  { %889 = vmatpush.bf16.msra.mxu3 %v1652_v61  ;;  %v1858_v13 = vld [vmem:[#allocation8 + $0x2a8] sm:$0xf0]  ;;  %v1399_v14 = vld [vmem:[#allocation8 + $0xd8] sm:$0xf]  ;;  %v1801_v15 = vld [vmem:[#allocation8 + $0xe0] sm:$0xf0]  ;;  %v1508_v17 = vor.u32 %v1828_v8, %v1507_v7 }
  0x2b   :  { %v1303_v18 = vld [vmem:[#allocation8 + $0x18] sm:$0xf]  ;;  %v1777_v19 = vld [vmem:[#allocation8 + $0x20] sm:$0xf0]  ;;  %v1628_v22 = vor.u32 %v1858_v13, %v1627_v11  ;;  %v1400_v23 = vor.u32 %v1801_v15, %v1399_v14  ;;  %v1615_v24 = vld [vmem:[#allocation8 + $0x288] sm:$0xf] }
  0x2c   :  { %865 = vmatpush.bf16.msrb.mxu1 %v1436_v48  ;;  %v1495_v20 = vld [vmem:[#allocation8 + $0x198] sm:$0xf]  ;;  %v1825_v21 = vld [vmem:[#allocation8 + $0x1a0] sm:$0xf0]  ;;  %v1387_v25 = vld [vmem:[#allocation8 + $0xc0] sm:$0xf]  ;;  %v1304_v29 = vor.u32 %v1777_v19, %v1303_v18 }
  0x2d   :  { %852 = vmatpush.bf16.msra.mxu0 %v1340_v53  ;;  %878 = vmatpush.bf16.msrb.mxu2 %v1532_v54  ;;  %v1798_v26 = vld [vmem:[#allocation8 + $0xc8] sm:$0xf0]  ;;  %v1473_v28 = vld [vmem:[#allocation8 + $0x174] sm:$0xf0]  ;;  %v1496_v30 = vor.u32 %v1825_v21, %v1495_v20  ;;  %v1291_v31 = vld [vmem:[#allocation8] sm:$0xf] }
  0x2e   :  { %1288 = vmatmul.msk.bf16.vlgmr.msrb.gmra.mxu3 %vm138_vm0, %v2122_v12  ;;  %v1855_v12 = vld [vmem:[#allocation8 + $0x290] sm:$0xf0]  ;;  %v1818_v27 = vld [vmem:[#allocation8 + $0x16c] sm:$0xf]  ;;  %v1483_v33 = vld [vmem:[#allocation8 + $0x180] sm:$0xf]  ;;  %v1388_v37 = vor.u32 %v1798_v26, %v1387_v25 }
  0x2f   :  { %890 = vmatpush.bf16.msra.mxu3 %v1640_v9  ;;  %v1774_v32 = vld [vmem:[#allocation8 + $0x8] sm:$0xf0]  ;;  %v1616_v36 = vor.u32 %v1855_v12, %v1615_v24  ;;  %v1377_v38 = vld [vmem:[#allocation8 + $0xb4] sm:$0xf0]  ;;  %v1476_v41 = vor.u32 %v1818_v27, %v1473_v28  ;;  %v1603_v42 = vld [vmem:[#allocation8 + $0x270] sm:$0xf] }
  0x30   :  { %866 = vmatpush.bf16.msrb.mxu1 %v1424_v62  ;;  %v1822_v34 = vld [vmem:[#allocation8 + $0x188] sm:$0xf0]  ;;  %v1569_v40 = vld [vmem:[#allocation8 + $0x234] sm:$0xf0]  ;;  %v1852_v43 = vld [vmem:[#allocation8 + $0x278] sm:$0xf0]  ;;  %v1292_v46 = vor.u32 %v1774_v32, %v1291_v31 }
  0x31   :  { %853 = vmatpush.bf16.msra.mxu0 %v1328_v2  ;;  %879 = vmatpush.bf16.msrb.mxu2 %v1520_v3  ;;  %v1794_v35 = vld [vmem:[#allocation8 + $0xac] sm:$0xf]  ;;  %v1815_v44 = vld [vmem:[#allocation8 + $0x154] sm:$0xf]  ;;  %v1461_v45 = vld [vmem:[#allocation8 + $0x15c] sm:$0xf0]  ;;  %v1484_v47 = vor.u32 %v1822_v34, %v1483_v33  ;;  %v1604_v54 = vor.u32 %v1852_v43, %v1603_v42 }
  0x32   :  { %v1842_v39 = vld [vmem:[#allocation8 + $0x22c] sm:$0xf]  ;;  %v1380_v48 = vor.u32 %v1794_v35, %v1377_v38  ;;  %v1791_v50 = vld [vmem:[#allocation8 + $0x94] sm:$0xf]  ;;  %v1365_v51 = vld [vmem:[#allocation8 + $0x9c] sm:$0xf0]  ;;  %v1464_v55 = vor.u32 %v1815_v44, %v1461_v45 }
  0x33   :  { %891 = vmatpush.bf16.msra.mxu3 %v1628_v22  ;;  %v1572_v49 = vor.u32 %v1842_v39, %v1569_v40  ;;  %v1839_v52 = vld [vmem:[#allocation8 + $0x214] sm:$0xf]  ;;  %v1557_v53 = vld [vmem:[#allocation8 + $0x21c] sm:$0xf0]  ;;  %v1591_v56 = vld [vmem:[#allocation8 + $0x258] sm:$0xf]  ;;  %v1368_v60 = vor.u32 %v1791_v50, %v1365_v51 }
  0x34   :  { %867 = vmatpush.bf16.msrb.mxu1 %v1412_v10  ;;  %v1849_v57 = vld [vmem:[#allocation8 + $0x260] sm:$0xf0]  ;;  %v1812_v58 = vld [vmem:[#allocation8 + $0x13c] sm:$0xf]  ;;  %v1449_v59 = vld [vmem:[#allocation8 + $0x144] sm:$0xf0]  ;;  %v1560_v61 = vor.u32 %v1839_v52, %v1557_v53 }
  0x35   :  { %854 = vmatpush.bf16.msra.mxu0 %v1316_v16  ;;  %880 = vmatpush.bf16.msrb.mxu2 %v1508_v17  ;;  %v1788_v62 = vld [vmem:[#allocation8 + $0x7c] sm:$0xf]  ;;  %v1353_v63 = vld [vmem:[#allocation8 + $0x84] sm:$0xf0]  ;;  %v1592_v2 = vor.u32 %v1849_v57, %v1591_v56  ;;  %v1452_v3 = vor.u32 %v1812_v58, %v1449_v59  ;;  %v1809_v4 = vld [vmem:[#allocation8 + $0x124] sm:$0xf] }
  0x36   :  { %v1836_v0 = vld [vmem:[#allocation8 + $0x1fc] sm:$0xf]  ;;  %v1545_v1 = vld [vmem:[#allocation8 + $0x204] sm:$0xf0]  ;;  %v1437_v5 = vld [vmem:[#allocation8 + $0x12c] sm:$0xf0]  ;;  %v1356_v6 = vor.u32 %v1788_v62, %v1353_v63 }
  0x37   :  { %892 = vmatpush.bf16.msra.mxu3 %v1616_v36  ;;  %v1548_v7 = vor.u32 %v1836_v0, %v1545_v1  ;;  %v1785_v8 = vld [vmem:[#allocation8 + $0x64] sm:$0xf]  ;;  %v1341_v9 = vld [vmem:[#allocation8 + $0x6c] sm:$0xf0]  ;;  %v1440_v13 = vor.u32 %v1809_v4, %v1437_v5  ;;  %v1806_v14 = vld [vmem:[#allocation8 + $0x10c] sm:$0xf] }
  0x38   :  { %868 = vmatpush.bf16.msrb.mxu1 %v1400_v23  ;;  %v1833_v10 = vld [vmem:[#allocation8 + $0x1e4] sm:$0xf]  ;;  %v1533_v11 = vld [vmem:[#allocation8 + $0x1ec] sm:$0xf0]  ;;  %v1425_v15 = vld [vmem:[#allocation8 + $0x114] sm:$0xf0]  ;;  %v1344_v16 = vor.u32 %v1785_v8, %v1341_v9 }
  0x39   :  { %855 = vmatpush.bf16.msra.mxu0 %v1304_v29  ;;  %881 = vmatpush.bf16.msrb.mxu2 %v1496_v30  ;;  %v1536_v17 = vor.u32 %v1833_v10, %v1533_v11  ;;  %v1428_v18 = vor.u32 %v1806_v14, %v1425_v15  ;;  %v1803_v19 = vld [vmem:[#allocation8 + $0xf4] sm:$0xf]  ;;  %v1413_v20 = vld [vmem:[#allocation8 + $0xfc] sm:$0xf0]  ;;  %v1846_v23 = vld [vmem:[#allocation8 + $0x248] sm:$0xf0] }
  0x3a   :  { %v1416_v21 = vor.u32 %v1803_v19, %v1413_v20  ;;  %v1579_v22 = vld [vmem:[#allocation8 + $0x240] sm:$0xf]  ;;  %v1782_v12 = vld [vmem:[#allocation8 + $0x4c] sm:$0xf]  ;;  %v1329_v25 = vld [vmem:[#allocation8 + $0x54] sm:$0xf0] }
  0x3b   :  { %893 = vmatpush.bf16.msra.mxu3 %v1604_v54  ;;  %v1580_v24 = vor.u32 %v1846_v23, %v1579_v22  ;;  %v1830_v26 = vld [vmem:[#allocation8 + $0x1cc] sm:$0xf]  ;;  %v1332_v27 = vor.u32 %v1782_v12, %v1329_v25  ;;  %v1521_v28 = vld [vmem:[#allocation8 + $0x1d4] sm:$0xf0]  ;;  %v1800_v33 = vld [vmem:[#allocation8 + $0xdc] sm:$0xf] }
  0x3c   :  { %869 = vmatpush.bf16.msrb.mxu1 %v1388_v37  ;;  %v1866_v29 = vld [vmem:[#allocation8 + $0x2ec] sm:$0xf]  ;;  %v1665_v30 = vld [vmem:[#allocation8 + $0x2f4] sm:$0xf0]  ;;  %v1524_v31 = vor.u32 %v1830_v26, %v1521_v28  ;;  %v1401_v34 = vld [vmem:[#allocation8 + $0xe4] sm:$0xf0] }
  0x3d   :  { %856 = vmatpush.bf16.msra.mxu0 %v1292_v46  ;;  %882 = vmatpush.bf16.msrb.mxu2 %v1484_v47  ;;  %v1668_v32 = vor.u32 %v1866_v29, %v1665_v30  ;;  %v1404_v35 = vor.u32 %v1800_v33, %v1401_v34  ;;  %v1779_v36 = vld [vmem:[#allocation8 + $0x34] sm:$0xf]  ;;  %v1317_v37 = vld [vmem:[#allocation8 + $0x3c] sm:$0xf0]  ;;  %v1797_v45 = vld [vmem:[#allocation8 + $0xc4] sm:$0xf] }
  0x3e   :  { %v1827_v38 = vld [vmem:[#allocation8 + $0x1b4] sm:$0xf]  ;;  %v1320_v39 = vor.u32 %v1779_v36, %v1317_v37  ;;  %v1509_v40 = vld [vmem:[#allocation8 + $0x1bc] sm:$0xf0]  ;;  %v1389_v46 = vld [vmem:[#allocation8 + $0xcc] sm:$0xf0] }
  0x3f   :  { %894 = vmatpush.bf16.msra.mxu3 %v1592_v2  ;;  %v1653_v42 = vld [vmem:[#allocation8 + $0x2dc] sm:$0xf0]  ;;  %v1512_v43 = vor.u32 %v1827_v38, %v1509_v40  ;;  %v1392_v47 = vor.u32 %v1797_v45, %v1389_v46  ;;  %v1824_v50 = vld [vmem:[#allocation8 + $0x19c] sm:$0xf]  ;;  %v1497_v52 = vld [vmem:[#allocation8 + $0x1a4] sm:$0xf0] }
  0x40   :  { %914 = vmatpush.bf16.msra.mxu1 %v1476_v41  ;;  %v1863_v41 = vld [vmem:[#allocation8 + $0x2d4] sm:$0xf]  ;;  %v1860_v53 = vld [vmem:[#allocation8 + $0x2bc] sm:$0xf]  ;;  %v1641_v54 = vld [vmem:[#allocation8 + $0x2c4] sm:$0xf0] }
  0x41   :  { %901 = vmatpush.bf16.msrb.mxu0 %v1380_v48  ;;  %927 = vmatpush.bf16.msra.mxu2 %v1572_v49  ;;  %v1656_v44 = vor.u32 %v1863_v41, %v1653_v42  ;;  %v1776_v48 = vld [vmem:[#allocation8 + $0x1c] sm:$0xf]  ;;  %v1305_v49 = vld [vmem:[#allocation8 + $0x24] sm:$0xf0]  ;;  %v1644_v56 = vor.u32 %v1860_v53, %v1641_v54  ;;  %v1773_v57 = vld [vmem:[#allocation8 + $0x4] sm:$0xf] }
  0x42   :  { %v1308_v51 = vor.u32 %v1776_v48, %v1305_v49  ;;  %v1293_v58 = vld [vmem:[#allocation8 + $0xc] sm:$0xf0]  ;;  %v1821_v59 = vld [vmem:[#allocation8 + $0x184] sm:$0xf]  ;;  %v1854_v2 = vld [vmem:[#allocation8 + $0x28c] sm:$0xf] }
  0x43   :  { %895 = vmatpush.bf16.msra.mxu3 %v1580_v24  ;;  %v1857_v62 = vld [vmem:[#allocation8 + $0x2a4] sm:$0xf]  ;;  %v1629_v63 = vld [vmem:[#allocation8 + $0x2ac] sm:$0xf0]  ;;  %v1851_v5 = vld [vmem:[#allocation8 + $0x274] sm:$0xf] }
  0x44   :  { %915 = vmatpush.bf16.msra.mxu1 %v1464_v55  ;;  %v1500_v55 = vor.u32 %v1824_v50, %v1497_v52  ;;  %v1632_v1 = vor.u32 %v1857_v62, %v1629_v63  ;;  %v1848_v8 = vld [vmem:[#allocation8 + $0x25c] sm:$0xf]  ;;  %v1593_v9 = vld [vmem:[#allocation8 + $0x264] sm:$0xf0]  ;;  %v2132_v11 = vld [vmem:[#allocation11] sm:$0xf] }
  0x45   :  { %902 = vmatpush.bf16.msrb.mxu0 %v1368_v60  ;;  %928 = vmatpush.bf16.msra.mxu2 %v1560_v61  ;;  %v1296_v60 = vor.u32 %v1773_v57, %v1293_v58  ;;  %v1485_v61 = vld [vmem:[#allocation8 + $0x18c] sm:$0xf0]  ;;  %v1596_v10 = vor.u32 %v1848_v8, %v1593_v9  ;;  %v1820_v20 = vld [vmem:[#allocation8 + $0x178] sm:$0xf0]  ;;  %v112_v23 = vperm.slane %v2132_v11, 2  ;;  %s1257_s29 = sshll.u32 %s2170_s6, 4  ;;  %s1258_s29 = int_to_ptr.hbm [resolvable:$true] %s1257_s29 }
  0x46   :  { %v1488_v0 = vor.u32 %v1821_v59, %v1485_v61  ;;  %v1581_v14 = vld [vmem:[#allocation8 + $0x24c] sm:$0xf0]  ;;  %v1467_v26 = vld [vmem:[#allocation8 + $0x158] sm:$0xf]  ;;  %v1844_v34 = vld [vmem:[#allocation8 + $0x238] sm:$0xf0] }
  0x47   :  { %940 = vmatpush.bf16.msrb.mxu3 %v1668_v32  ;;  %v1479_v19 = vld [vmem:[#allocation8 + $0x170] sm:$0xf]  ;;  %v1455_v40 = vld [vmem:[#allocation8 + $0x140] sm:$0xf]  ;;  %v1814_v41 = vld [vmem:[#allocation8 + $0x148] sm:$0xf0] }
  0x48   :  { %916 = vmatpush.bf16.msra.mxu1 %v1452_v3  ;;  %v1617_v3 = vld [vmem:[#allocation8 + $0x294] sm:$0xf0]  ;;  %v1480_v24 = vor.u32 %v1820_v20, %v1479_v19  ;;  %v1383_v30 = vld [vmem:[#allocation8 + $0xb0] sm:$0xf]  ;;  %v1793_v45 = vld [vmem:[#allocation8 + $0xa0] sm:$0xf0]  ;;  %v1456_v49 = vor.u32 %v1814_v41, %v1455_v40 }
  0x49   :  { %903 = vmatpush.bf16.msrb.mxu0 %v1356_v6  ;;  %929 = vmatpush.bf16.msra.mxu2 %v1548_v7  ;;  %v1620_v4 = vor.u32 %v1854_v2, %v1617_v3  ;;  %v1605_v6 = vld [vmem:[#allocation8 + $0x27c] sm:$0xf0]  ;;  %v1575_v33 = vld [vmem:[#allocation8 + $0x230] sm:$0xf]  ;;  %v1841_v48 = vld [vmem:[#allocation8 + $0x220] sm:$0xf0] }
  0x4a   :  { %v1608_v7 = vor.u32 %v1851_v5, %v1605_v6  ;;  %v1443_v52 = vld [vmem:[#allocation8 + $0x128] sm:$0xf]  ;;  %v1811_v53 = vld [vmem:[#allocation8 + $0x130] sm:$0xf0]  ;;  %v1790_v57 = vld [vmem:[#allocation8 + $0x88] sm:$0xf0] }
  0x4b   :  { %941 = vmatpush.bf16.msrb.mxu3 %v1656_v44  ;;  %v1371_v44 = vld [vmem:[#allocation8 + $0x98] sm:$0xf]  ;;  %v1551_v58 = vld [vmem:[#allocation8 + $0x200] sm:$0xf]  ;;  %v1838_v59 = vld [vmem:[#allocation8 + $0x208] sm:$0xf0] }
  0x4c   :  { %917 = vmatpush.bf16.msra.mxu1 %v1440_v13  ;;  %v1845_v13 = vld [vmem:[#allocation8 + $0x244] sm:$0xf]  ;;  %v1431_v62 = vld [vmem:[#allocation8 + $0x110] sm:$0xf]  ;;  %v1808_v63 = vld [vmem:[#allocation8 + $0x118] sm:$0xf0] }
  0x4d   :  { %904 = vmatpush.bf16.msrb.mxu0 %v1344_v16  ;;  %930 = vmatpush.bf16.msra.mxu2 %v1536_v17  ;;  %v1584_v15 = vor.u32 %v1845_v13, %v1581_v14  ;;  %v111_v16 = vperm.slane %v2132_v11, 1  ;;  %v1347_v2 = vld [vmem:[#allocation8 + $0x68] sm:$0xf]  ;;  %v1787_v3 = vld [vmem:[#allocation8 + $0x70] sm:$0xf0]  ;;  %v1432_v6 = vor.u32 %v1808_v63, %v1431_v62 }
  0x4e   :  { %v1835_v5 = vld [vmem:[#allocation8 + $0x1f0] sm:$0xf0]  ;;  %v1348_v8 = vor.u32 %v1787_v3, %v1347_v2  ;;  %v1419_v9 = vld [vmem:[#allocation8 + $0xf8] sm:$0xf]  ;;  %v1671_v20 = vld [vmem:[#allocation8 + $0x2f0] sm:$0xf] }
  0x4f   :  { %942 = vmatpush.bf16.msrb.mxu3 %v1644_v56  ;;  %v1359_v56 = vld [vmem:[#allocation8 + $0x80] sm:$0xf]  ;;  %v1623_v62 = vld [vmem:[#allocation8 + $0x290] sm:$0xf]  ;;  %v1856_v63 = vld [vmem:[#allocation8 + $0x298] sm:$0xf0] }
  0x50   :  { %918 = vmatpush.bf16.msra.mxu1 %v1428_v18  ;;  %v1360_v61 = vor.u32 %v1790_v57, %v1359_v56  ;;  %v1311_v40 = vld [vmem:[#allocation8 + $0x20] sm:$0xf]  ;;  %v1823_v56 = vld [vmem:[#allocation8 + $0x190] sm:$0xf0]  ;;  %v1635_v57 = vld [vmem:[#allocation8 + $0x2a8] sm:$0xf] }
  0x51   :  { %905 = vmatpush.bf16.msrb.mxu0 %v1332_v27  ;;  %931 = vmatpush.bf16.msra.mxu2 %v1524_v31  ;;  %v1817_v27 = vld [vmem:[#allocation8 + $0x160] sm:$0xf0]  ;;  %v1796_v31 = vld [vmem:[#allocation8 + $0xb8] sm:$0xf0] }
  0x52   :  { %v1468_v36 = vor.u32 %v1817_v27, %v1467_v26  ;;  %v1323_v27 = vld [vmem:[#allocation8 + $0x38] sm:$0xf]  ;;  %v1853_v2 = vld [vmem:[#allocation8 + $0x280] sm:$0xf0] }
  0x53   :  { %943 = vmatpush.bf16.msrb.mxu3 %v1632_v1  ;;  %v1552_v1 = vor.u32 %v1838_v59, %v1551_v58  ;;  %v1859_v58 = vld [vmem:[#allocation8 + $0x2b0] sm:$0xf0] }
  0x54   :  { %919 = vmatpush.bf16.msra.mxu1 %v1416_v21  ;;  %v110_v21 = vperm.slane %v2132_v11, 0 }
  0x55   :  { %906 = vmatpush.bf16.msrb.mxu0 %v1320_v39  ;;  %932 = vmatpush.bf16.msra.mxu2 %v1512_v43  ;;  %v1384_v39 = vor.u32 %v1796_v31, %v1383_v30  ;;  %v1576_v43 = vor.u32 %v1844_v34, %v1575_v33  ;;  %v1515_v30 = vld [vmem:[#allocation8 + $0x1b8] sm:$0xf]  ;;  %v1829_v31 = vld [vmem:[#allocation8 + $0x1c0] sm:$0xf0] }
  0x56   :  { %v1659_v33 = vld [vmem:[#allocation8 + $0x2d8] sm:$0xf]  ;;  %v1865_v34 = vld [vmem:[#allocation8 + $0x2e0] sm:$0xf0] }
  0x57   :  { %944 = vmatpush.bf16.msrb.mxu3 %v1620_v4  ;;  %v1539_v4 = vld [vmem:[#allocation8 + $0x1e8] sm:$0xf]  ;;  %v1660_v41 = vor.u32 %v1865_v34, %v1659_v33  ;;  %v1889_v33 = vld [vmem:[#allocation9 + $0xa0] sm:$0xff] }
  0x58   :  { %920 = vmatpush.bf16.msra.mxu1 %v1404_v35  ;;  %v1540_v14 = vor.u32 %v1835_v5, %v1539_v4  ;;  %v1599_v4 = vld [vmem:[#allocation8 + $0x260] sm:$0xf]  ;;  %v1850_v5 = vld [vmem:[#allocation8 + $0x268] sm:$0xf0] }
  0x59   :  { %907 = vmatpush.bf16.msrb.mxu0 %v1308_v51  ;;  %933 = vmatpush.bf16.msra.mxu2 %v1500_v55  ;;  %v1372_v51 = vor.u32 %v1793_v45, %v1371_v44  ;;  %v1503_v44 = vld [vmem:[#allocation8 + $0x1a0] sm:$0xf]  ;;  %v1826_v45 = vld [vmem:[#allocation8 + $0x1a8] sm:$0xf0] }
  0x5b   :  { %945 = vmatpush.bf16.msrb.mxu3 %v1608_v7 }
  0x5c   :  { %921 = vmatpush.bf16.msra.mxu1 %v1392_v47  ;;  %v1563_v47 = vld [vmem:[#allocation8 + $0x218] sm:$0xf] }
  0x5d   :  { %908 = vmatpush.bf16.msrb.mxu0 %v1296_v60  ;;  %934 = vmatpush.bf16.msra.mxu2 %v1488_v0  ;;  %v1564_v54 = vor.u32 %v1841_v48, %v1563_v47  ;;  %v1444_v60 = vor.u32 %v1811_v53, %v1443_v52  ;;  %v113_v0 = vperm.slane %v2132_v11, 3  ;;  %v1527_v11 = vld [vmem:[#allocation8 + $0x1d0] sm:$0xf]  ;;  %v1647_v48 = vld [vmem:[#allocation8 + $0x2c0] sm:$0xf] }
  0x5e   :  { %v1299_v52 = vld [vmem:[#allocation8 + $0x8] sm:$0xf] }
  0x5f   :  { %946 = vmatpush.bf16.msrb.mxu3 %v1596_v10  ;;  %v1805_v10 = vld [vmem:[#allocation8 + $0x100] sm:$0xf0] }
  0x60   :  { %v1420_v19 = vor.u32 %v1805_v10, %v1419_v9  ;;  %v1876_v9 = vld [vmem:[#allocation9 + $0x38] sm:$0xff]  ;;  %v1875_v10 = vld [vmem:[#allocation9 + $0x30] sm:$0xff] }
  0x63   :  { %947 = vmatpush.bf16.msrb.mxu3 %v1584_v15  ;;  %v1335_v15 = vld [vmem:[#allocation8 + $0x50] sm:$0xf] }
  0x9c   :  { %v164_v17 = vpop.f32.mrf.mxu1 }
  0x9d   :  { %v165_v18 = vadd.f32 %v164_v17, %v111_v16  ;;  %v1784_v16 = vld [vmem:[#allocation8 + $0x58] sm:$0xf0] }
  0x9e   :  { %v1832_v17 = vld [vmem:[#allocation8 + $0x1d8] sm:$0xf0] }
  0x9f   :  { %v195_v22 = vmax.f32 %v165_v18, 0.0  ;;  %v1528_v26 = vor.u32 %v1832_v17, %v1527_v11  ;;  %v1870_v11 = vld [vmem:[#allocation9 + $0x8] sm:$0xff] }
  0xa0   :  { %v1882_v17 = vld [vmem:[#allocation9 + $0x68] sm:$0xff] }
  0xa1   :  { %v2137_v12 = vpack.c.bf16 %v195_v22, %v195_v22  ;;  %v151_v25 = vpop.f32.mrf.mxu3  ;;  %v1407_v22 = vld [vmem:[#allocation8 + $0xe0] sm:$0xf] }
  0xa2   :  { %v152_v28 = vadd.f32 %v151_v25, %v110_v21  ;;  %v1868_v21 = vld [vmem:[#allocation8 + $0x2f8] sm:$0xf0]  ;;  %v1336_v25 = vor.u32 %v1784_v16, %v1335_v15  ;;  %v1871_v15 = vld [vmem:[#allocation9 + $0x10] sm:$0xff] }
  0xa3   :  { %v177_v29 = vpop.f32.mrf.mxu2  ;;  %870 = vmatmul.bf16.vlgmr.msrb.gmra.mxu1 %v2137_v12  ;;  %v1883_v16 = vld [vmem:[#allocation9 + $0x70] sm:$0xff] }
  0xa4   :  { %v178_v32 = vadd.f32 %v177_v29, %v112_v23  ;;  %v194_v35 = vmax.f32 %v152_v28, 0.0  ;;  %966 = vmatpush.bf16.msrb.mxu1 %v1480_v24  ;;  %v166_v37 = vpop.f32.mrf.mxu1  ;;  %v1802_v23 = vld [vmem:[#allocation8 + $0xe8] sm:$0xf0]  ;;  %v1672_v28 = vor.u32 %v1868_v21, %v1671_v20  ;;  %v1781_v29 = vld [vmem:[#allocation8 + $0x40] sm:$0xf0]  ;;  %v1880_v21 = vld [vmem:[#allocation9 + $0x58] sm:$0xff] }
  0xa5   :  { %v1799_v37 = vld [vmem:[#allocation8 + $0xd0] sm:$0xf0] }
  0xa6   :  { %v196_v38 = vmax.f32 %v178_v32, 0.0  ;;  %v2140_v42 = vpack.c.bf16 %v194_v35, %v194_v35  ;;  %v1408_v32 = vor.u32 %v1802_v23, %v1407_v22  ;;  %v1892_v22 = vld [vmem:[#allocation9 + $0xb8] sm:$0xff] }
  0xa8   :  { %v2142_v46 = vpack.c.bf16 %v196_v38, %v196_v38  ;;  %967 = vmatpush.bf16.msrb.mxu1 %v1468_v36  ;;  %857 = vmatmul.bf16.vlgmr.msra.gmra.mxu0 %v2140_v42  ;;  %v1395_v36 = vld [vmem:[#allocation8 + $0xc8] sm:$0xf]  ;;  %v1324_v38 = vor.u32 %v1781_v29, %v1323_v27 }
  0xa9   :  { %v153_v50 = vpop.f32.mrf.mxu3  ;;  %953 = vmatpush.bf16.msra.mxu0 %v1384_v39  ;;  %v1516_v39 = vor.u32 %v1829_v31, %v1515_v30  ;;  %v1396_v47 = vor.u32 %v1799_v37, %v1395_v36  ;;  %v1878_v27 = vld [vmem:[#allocation9 + $0x48] sm:$0xff]  ;;  %v101_v30 = vld [vmem:[#allocation11 + $0x4] sm:$0x7]  ;;  %v1888_v36 = vld [vmem:[#allocation9 + $0x98] sm:$0xff] }
  0xaa   :  { %883 = vmatmul.bf16.vlgmr.msrb.gmra.mxu2 %v2142_v46  ;;  %v331_v34 = vperm.slane %v101_v30, 0 }
  0xab   :  { %979 = vmatpush.bf16.msrb.mxu2 %v1576_v43  ;;  %v179_v55 = vpop.f32.mrf.mxu2  ;;  %v1778_v43 = vld [vmem:[#allocation8 + $0x28] sm:$0xf0] }
  0xac   :  { %968 = vmatpush.bf16.msrb.mxu1 %v1456_v49  ;;  %v1862_v49 = vld [vmem:[#allocation8 + $0x2c8] sm:$0xf0]  ;;  %v1312_v50 = vor.u32 %v1778_v43, %v1311_v40  ;;  %v1491_v55 = vld [vmem:[#allocation8 + $0x188] sm:$0xf] }
  0xad   :  { %954 = vmatpush.bf16.msra.mxu0 %v1372_v51  ;;  %v1504_v51 = vor.u32 %v1826_v45, %v1503_v44  ;;  %v1648_v53 = vor.u32 %v1862_v49, %v1647_v48 }
  0xaf   :  { %980 = vmatpush.bf16.msrb.mxu2 %v1564_v54  ;;  %v1775_v54 = vld [vmem:[#allocation8 + $0x10] sm:$0xf0] }
  0xb0   :  { %969 = vmatpush.bf16.msrb.mxu1 %v1444_v60  ;;  %v1300_v59 = vor.u32 %v1775_v54, %v1299_v52  ;;  %v1492_v60 = vor.u32 %v1823_v56, %v1491_v55  ;;  %v1885_v52 = vld [vmem:[#allocation9 + $0x80] sm:$0xff] }
  0xb1   :  { %v190_v7 = vpop.f32.mrf.mxu3  ;;  %955 = vmatpush.bf16.msra.mxu0 %v1360_v61  ;;  %v1636_v61 = vor.u32 %v1859_v58, %v1635_v57 }
  0xb2   :  { %v191_v13 = vadd.f32 %v190_v7, %v113_v0  ;;  %v1624_v0 = vor.u32 %v1856_v63, %v1623_v62  ;;  %v1847_v7 = vld [vmem:[#allocation8 + $0x250] sm:$0xf0] }
  0xb3   :  { %981 = vmatpush.bf16.msrb.mxu2 %v1552_v1  ;;  %922 = vmatmul.bf16.vlgmr.msra.gmra.mxu1 %v2137_v12  ;;  %v1611_v1 = vld [vmem:[#allocation8 + $0x278] sm:$0xf] }
  0xb4   :  { %v197_v18 = vmax.f32 %v191_v13, 0.0  ;;  %970 = vmatpush.bf16.msrb.mxu1 %v1432_v6  ;;  %v1612_v3 = vor.u32 %v1853_v2, %v1611_v1  ;;  %v1587_v6 = vld [vmem:[#allocation8 + $0x248] sm:$0xf]  ;;  %v1872_v13 = vld [vmem:[#allocation9 + $0x18] sm:$0xff] }
  0xb5   :  { %956 = vmatpush.bf16.msra.mxu0 %v1348_v8  ;;  %v1588_v8 = vor.u32 %v1847_v7, %v1587_v6 }
  0xb6   :  { %v2148_v24 = vpack.c.bf16 %v197_v18, %v197_v18  ;;  %v1869_v18 = vld [vmem:[#allocation9] sm:$0xff] }
  0xb7   :  { %982 = vmatpush.bf16.msrb.mxu2 %v1540_v14  ;;  %v1884_v14 = vld [vmem:[#allocation9 + $0x78] sm:$0xff] }
  0xb8   :  { %971 = vmatpush.bf16.msrb.mxu1 %v1420_v19  ;;  %896 = vmatmul.bf16.vlgmr.msra.gmra.mxu3 %v2148_v24  ;;  %v1881_v19 = vld [vmem:[#allocation9 + $0x60] sm:$0xff] }
  0xb9   :  { %909 = vmatmul.bf16.vlgmr.msrb.gmra.mxu0 %v2140_v42  ;;  %v192_v35 = vpop.f32.mrf.mxu3  ;;  %992 = vmatpush.bf16.msra.mxu3 %v1672_v28  ;;  %v1890_v28 = vld [vmem:[#allocation9 + $0xa8] sm:$0xff] }
  0xba   :  { %935 = vmatmul.bf16.vlgmr.msra.gmra.mxu2 %v2142_v46  ;;  %957 = vmatpush.bf16.msra.mxu0 %v1336_v25  ;;  %v1891_v25 = vld [vmem:[#allocation9 + $0xb0] sm:$0xff] }
  0xbb   :  { %983 = vmatpush.bf16.msrb.mxu2 %v1528_v26 }
  0xbc   :  { %972 = vmatpush.bf16.msrb.mxu1 %v1408_v32  ;;  %v1877_v32 = vld [vmem:[#allocation9 + $0x40] sm:$0xff] }
  0xbd   :  { %993 = vmatpush.bf16.msra.mxu3 %v1660_v41 }
  0xbe   :  { %958 = vmatpush.bf16.msra.mxu0 %v1324_v38 }
  0xbf   :  { %984 = vmatpush.bf16.msrb.mxu2 %v1516_v39  ;;  %v1887_v39 = vld [vmem:[#allocation9 + $0x90] sm:$0xff] }
  0xc0   :  { %973 = vmatpush.bf16.msrb.mxu1 %v1396_v47  ;;  %v1886_v47 = vld [vmem:[#allocation9 + $0x88] sm:$0xff] }
  0xc1   :  { %994 = vmatpush.bf16.msra.mxu3 %v1648_v53  ;;  %v332_v53 = vperm.slane %v101_v30, 1 }
  0xc2   :  { %959 = vmatpush.bf16.msra.mxu0 %v1312_v50 }
  0xc3   :  { %985 = vmatpush.bf16.msrb.mxu2 %v1504_v51  ;;  %974 = vmatmul.bf16.vlgmr.msrb.gmra.mxu1 %v2137_v12  ;;  %v1600_v12 = vor.u32 %v1850_v5, %v1599_v4  ;;  %v333_v5 = vperm.slane %v101_v30, 2 }
  0xc4   :  { %1219 = vmatpush.bf16.msra.mxu1 %v1884_v14 }
  0xc5   :  { %995 = vmatpush.bf16.msra.mxu3 %v1636_v61 }
  0xc6   :  { %960 = vmatpush.bf16.msra.mxu0 %v1300_v59 }
  0xc7   :  { %986 = vmatpush.bf16.msrb.mxu2 %v1492_v60 }
  0xc8   :  { %948 = vmatmul.bf16.vlgmr.msrb.gmra.mxu3 %v2148_v24  ;;  %1220 = vmatpush.bf16.msra.mxu1 %v1883_v16 }
  0xc9   :  { %961 = vmatmul.bf16.vlgmr.msra.gmra.mxu0 %v2140_v42  ;;  %996 = vmatpush.bf16.msra.mxu3 %v1624_v0  ;;  %v1874_v42 = vld [vmem:[#allocation9 + $0x28] sm:$0xff] }
  0xca   :  { %987 = vmatmul.bf16.vlgmr.msrb.gmra.mxu2 %v2142_v46  ;;  %1206 = vmatpush.bf16.msrb.mxu0 %v1876_v9  ;;  %v1873_v46 = vld [vmem:[#allocation9 + $0x20] sm:$0xff] }
  0xcb   :  { %1232 = vmatpush.bf16.msra.mxu2 %v1892_v22 }
  0xcc   :  { %1221 = vmatpush.bf16.msra.mxu1 %v1882_v17 }
  0xcd   :  { %997 = vmatpush.bf16.msra.mxu3 %v1612_v3 }
  0xce   :  { %1207 = vmatpush.bf16.msrb.mxu0 %v1875_v10 }
  0xcf   :  { %1233 = vmatpush.bf16.msra.mxu2 %v1891_v25 }
  0xd0   :  { %1222 = vmatpush.bf16.msra.mxu1 %v1881_v19 }
  0xd1   :  { %998 = vmatpush.bf16.msra.mxu3 %v1600_v12 }
  0xd2   :  { %1208 = vmatpush.bf16.msrb.mxu0 %v1874_v42 }
  0xd3   :  { %1234 = vmatpush.bf16.msra.mxu2 %v1890_v28 }
  0xd4   :  { %1223 = vmatpush.bf16.msra.mxu1 %v1880_v21 }
  0xd5   :  { %999 = vmatpush.bf16.msra.mxu3 %v1588_v8 }
  0xd6   :  { %1209 = vmatpush.bf16.msrb.mxu0 %v1873_v46 }
  0xd7   :  { %1235 = vmatpush.bf16.msra.mxu2 %v1889_v33 }
  0xd8   :  { %1000 = vmatmul.bf16.vlgmr.msra.gmra.mxu3 %v2148_v24  ;;  %v1879_v24 = vld [vmem:[#allocation9 + $0x50] sm:$0xff] }
  0xd9   :  { %1224 = vmatpush.bf16.msra.mxu1 %v1879_v24 }
  0xda   :  { %1210 = vmatpush.bf16.msrb.mxu0 %v1872_v13 }
  0xdb   :  { %1236 = vmatpush.bf16.msra.mxu2 %v1888_v36 }
  0xdd   :  { %1225 = vmatpush.bf16.msra.mxu1 %v1878_v27 }
  0xde   :  { %1211 = vmatpush.bf16.msrb.mxu0 %v1871_v15 }
  0xdf   :  { %1237 = vmatpush.bf16.msra.mxu2 %v1887_v39 }
  0xe1   :  { %1226 = vmatpush.bf16.msra.mxu1 %v1877_v32 }
  0xe2   :  { %1212 = vmatpush.bf16.msrb.mxu0 %v1870_v11 }
  0xe3   :  { %1238 = vmatpush.bf16.msra.mxu2 %v1886_v47 }
  0xe6   :  { %1213 = vmatpush.bf16.msrb.mxu0 %v1869_v18  ;;  %v1905_v18 = vld [vmem:[#allocation11 + $0x7] ss:$0 sm:$0xff] }
  0xe7   :  { %1239 = vmatpush.bf16.msra.mxu2 %v1885_v52 }
 0x120   :  { %v871_v20 = vpop.f32.mrf.mxu1 }
 0x125   :  { %v858_v23 = vpop.f32.mrf.mxu0 }
 0x126   :  { %v859_v37 = vadd.f32 %v858_v23, %v331_v34  ;;  %v1247_v23 = vstv %s2164_s0 }
 0x128   :  { %v873_v26 = vpop.f32.mrf.mxu1  ;;  %v872_v41 = vadd.f32 %v871_v20, %v859_v37 }
 0x12d   :  { %v884_v29 = vpop.f32.mrf.mxu2  ;;  %v860_v31 = vpop.f32.mrf.mxu0 }
 0x12e   :  { %v885_v44 = vadd.f32 %v884_v29, %v872_v41 }
 0x130   :  { %v923_v35 = vpop.f32.mrf.mxu1 }
 0x135   :  { %v886_v38 = vpop.f32.mrf.mxu2 }
 0x136   :  { %v910_v40 = vpop.f32.mrf.mxu0 }
 0x137   :  { %v911_v57 = vadd.f32 %v910_v40, %v332_v53 }
 0x138   :  { %v925_v43 = vpop.f32.mrf.mxu1 }
 0x139   :  { %v924_v60 = vadd.f32 %v923_v35, %v911_v57 }
 0x13b   :  { %v897_v45 = vpop.f32.mrf.mxu3 }
 0x13c   :  { %v898_v48 = vadd.f32 %v897_v45, %v885_v44 }
 0x13d   :  { %v936_v49 = vpop.f32.mrf.mxu2 }
 0x13e   :  { %v1005_v50 = vmax.f32 %v898_v48, 0.0  ;;  %v912_v51 = vpop.f32.mrf.mxu0  ;;  %v937_v62 = vadd.f32 %v936_v49, %v924_v60 }
 0x140   :  { %v1008_v54 = vpack.c.bf16 %v1005_v50, %v1005_v50  ;;  %v975_v55 = vpop.f32.mrf.mxu1 }
 0x142   :  { %1214 = vmatmul.bf16.vlgmr.msrb.gmra.mxu0 %v1008_v54 }
 0x143   :  { %v899_v56 = vpop.f32.mrf.mxu3 }
 0x145   :  { %v938_v58 = vpop.f32.mrf.mxu2 }
 0x146   :  { %v962_v59 = vpop.f32.mrf.mxu0 }
 0x147   :  { %v963_v7 = vadd.f32 %v962_v59, %v333_v5 }
 0x148   :  { %v977_v61 = vpop.f32.mrf.mxu1 }
 0x149   :  { %v976_v8 = vadd.f32 %v975_v55, %v963_v7 }
 0x14b   :  { %v949_v63 = vpop.f32.mrf.mxu3 }
 0x14c   :  { %v950_v0 = vadd.f32 %v949_v63, %v937_v62 }
 0x14d   :  { %v988_v1 = vpop.f32.mrf.mxu2 }
 0x14e   :  { %v1006_v2 = vmax.f32 %v950_v0, 0.0  ;;  %v964_v3 = vpop.f32.mrf.mxu0  ;;  %v989_v9 = vadd.f32 %v988_v1, %v976_v8 }
 0x150   :  { %v1009_v4 = vpack.c.bf16 %v1006_v2, %v1006_v2 }
 0x152   :  { %1227 = vmatmul.bf16.vlgmr.msra.gmra.mxu1 %v1009_v4 }
 0x153   :  { %v951_v12 = vpop.f32.mrf.mxu3 }
 0x155   :  { %v990_v6 = vpop.f32.mrf.mxu2 }
 0x15b   :  { %v1001_v10 = vpop.f32.mrf.mxu3 }
 0x15c   :  { %v1002_v42 = vadd.f32 %v1001_v10, %v989_v9 }
 0x15e   :  { %v1007_v46 = vmax.f32 %v1002_v42, 0.0 }
 0x160   :  { %v1010_v13 = vpack.c.bf16 %v1007_v46, %v1007_v46 }
 0x162   :  { %1240 = vmatmul.bf16.vlgmr.msra.gmra.mxu2 %v1010_v13 }
 0x163   :  { %v1003_v14 = vpop.f32.mrf.mxu3 }
 0x1bf   :  { %v1215_v15 = vpop.f32.mrf.mxu0 }
 0x1c0   :  { %v1216_v19 = vadd.f32 %v1905_v18, %v1215_v15 }
 0x1c7   :  { %v1217_v16 = vpop.f32.mrf.mxu0 }
 0x1cf   :  { %v1228_v11 = vpop.f32.mrf.mxu1 }
 0x1d0   :  { %v1229_v20 = vadd.f32 %v1228_v11, %v1216_v19 }
 0x1d7   :  { %v1230_v17 = vpop.f32.mrf.mxu1 }
 0x1e5   :  { %v1241_v21 = vpop.f32.mrf.mxu2 }
 0x1e6   :  { %v1242_v22 = vadd.f32 %v1241_v21, %v1229_v20 }
 0x1e8   :  { %1906 = vtanh.f32 %v1242_v22 }
 0x1ed   :  { %v1243_v24 = vpop.f32.mrf.mxu2 }
 0x1ee   :  { %v1907_v25 = vpop.eup %1906 }
 0x1ef   :  { %v1248_v26 = vmul.f32 %v1907_v25, %v1247_v23 }
 0x1f1   :  { %1249 = vst [vmem:[#allocation12] sm:$0xff] %v1248_v26 }
 0x1f2   :  { %1260 = dma.vmem_to_hbm [thread:$0]  %s1256_s26, 128, %s1258_s29, [#allocation5]  }
 0x1f3   :  { %2058 = dma.done.wait [#allocation5], 128  }
 0x1f4   :  { %2059 = vsyncadd [#allocation5], 4294967168 }
 0x1f5   :  { %1265 = vsyncpa [#allocation4], 1 }
 0x1f6   :  { %1266 = vsyncpa [#allocation7], 1 }
 0x1f7   :  { %1267 = vsyncpa [#allocation10], 1 }
 0x1f8   :  { %1268 = vsyncpa [#allocation5], 1 }

</bundles_post_ra>
